<compile_context>
chip_gen: v6e
topology: v6e:2x2x1
jax: 0.10.0
libtpu: 0.0.40
codegen_flags: <defaults>
</compile_context>

<pallas_src>
import functools

import jax
import jax.numpy as jnp
from jax.experimental import pallas as pl
from jax.experimental.pallas import tpu as pltpu


# ----------------------------- kernel ---------------------------------------


def fused_stack_kernel(x_ref, w1_ref, b1_ref, w2_ref, b2_ref, o_ref, act_ref):
    """One grid step = one residual block applied to one row tile.

    x_ref : (tm, L) f32          (fetched once per row tile; constant over layers)
    w*_ref: (1, L, L) bf16       (per-layer folded weight, (in, out) layout)
    b*_ref: (1, 1, L) f32        (per-layer folded bias)
    o_ref : (tm, L) out dtype    (written to HBM only after the last layer)
    act_ref: (tm, L) f32 VMEM scratch accumulator, resident across the layer axis.
    """
    layer = pl.program_id(1)

    @pl.when(layer == 0)
    def _init():
        act_ref[...] = x_ref[...].astype(jnp.float32)

    act = act_ref[...]

    # ---- layer 1: linear + folded BN + relu (dropout eval = identity) ----
    z = jnp.dot(act.astype(jnp.bfloat16), w1_ref[0],
                preferred_element_type=jnp.float32) + b1_ref[0]
    z = jnp.maximum(z, 0.0)

    # ---- layer 2: linear + folded BN + relu ----
    z = jnp.dot(z.astype(jnp.bfloat16), w2_ref[0],
                preferred_element_type=jnp.float32) + b2_ref[0]
    z = jnp.maximum(z, 0.0)

    # ---- residual (f32) ----
    act_ref[...] = act + z

    @pl.when(layer == pl.num_programs(1) - 1)
    def _finalize():
        o_ref[...] = act_ref[...].astype(o_ref.dtype)


# ----------------------------- wrapper ---------------------------------------


def _choose_tm(n):
    """Row-tile size: multiple of 16, capped at 1024, >=2 tiles when possible."""
    n16 = ((n + 15) // 16) * 16
    tm = min(1024, n16)
    if n16 >= 32:
        # Ensure at least 2 steps on the parallel row axis so v7x can use
        # both TensorCores; costs nothing on v5e/v6e.
        half = ((pl.cdiv(n16, 2) + 15) // 16) * 16
        tm = min(tm, max(16, half))
    return tm


def linear_stack_forward(x, params):
    """x: (N, L) f32.  params: stacked folded weights (see fold/stack below)."""
    N, L = x.shape
    w1, b1, w2, b2 = params["w1"], params["b1"], params["w2"], params["b2"]
    num_blocks = w1.shape[0]

    tm = _choose_tm(N)
    n_tiles = pl.cdiv(N, tm)
    n_pad = n_tiles * tm
    x_pad = x if n_pad == N else jnp.pad(x, ((0, n_pad - N), (0, 0)))

    row = lambda i, l: (i, 0)
    per_layer = lambda i, l: (l, 0, 0)

    flops = num_blocks * 4 * n_pad * L * L
    bytes_accessed = (2 * n_pad * L * 4                       # x in + out (f32)
                      + num_blocks * (2 * L * L * 2 + 2 * L * 4))  # bf16 W, f32 b

    out = pl.pallas_call(
        fused_stack_kernel,
        out_shape=jax.ShapeDtypeStruct((n_pad, L), x.dtype),
        grid_spec=pltpu.PrefetchScalarGridSpec(
            num_scalar_prefetch=0,
            grid=(n_tiles, num_blocks),
            in_specs=[
                pl.BlockSpec((tm, L), row),         # x tile (f32)
                pl.BlockSpec((1, L, L), per_layer),  # w1[l] (in,out) bf16, BN folded
                pl.BlockSpec((1, 1, L), per_layer),  # b1[l] f32, BN folded
                pl.BlockSpec((1, L, L), per_layer),  # w2[l] (in,out) bf16, BN folded
                pl.BlockSpec((1, 1, L), per_layer),  # b2[l] f32, BN folded
            ],
            out_specs=pl.BlockSpec((tm, L), row),
            scratch_shapes=[pltpu.VMEM((tm, L), jnp.float32)],
        ),
        compiler_params=pltpu.CompilerParams(
            dimension_semantics=("parallel", "arbitrary")),
        cost_estimate=pl.CostEstimate(
            flops=flops, transcendentals=0, bytes_accessed=bytes_accessed),
        input_output_aliases={0: 0},
    )(x_pad, w1, b1, w2, b2)

    return out[:N] if n_pad != N else out


forward = jax.jit(linear_stack_forward)


# ------------------------- parameter construction ----------------------------


def make_torch_style_params(key, linear_size):
    """Synthetic parameters matching nn.Linear / nn.BatchNorm1d shapes."""
    L = linear_size
    ks = jax.random.split(key, 10)
    w1 = jax.random.normal(ks[0], (L, L), jnp.float32) * 0.05
    b1 = jax.random.normal(ks[1], (L,), jnp.float32) * 0.05
    w2 = jax.random.normal(ks[2], (L, L), jnp.float32) * 0.05
    b2 = jax.random.normal(ks[3], (L,), jnp.float32) * 0.05
    g1 = 1.0 + 0.1 * jax.random.normal(ks[4], (L,), jnp.float32)
    be1 = 0.1 * jax.random.normal(ks[5], (L,), jnp.float32)
    rm1 = 0.1 * jax.random.normal(ks[6], (L,), jnp.float32)
    rv1 = jnp.abs(1.0 + 0.1 * jax.random.normal(ks[7], (L,), jnp.float32))
    g2 = 1.0 + 0.1 * jax.random.normal(ks[8], (L,), jnp.float32)
    be2 = 0.1 * jax.random.normal(ks[9], (L,), jnp.float32)
    rm2 = jnp.zeros((L,), jnp.float32)
    rv2 = jnp.ones((L,), jnp.float32)
    return dict(w1=w1, b1=b1, w2=w2, b2=b2,
                g1=g1, be1=be1, rm1=rm1, rv1=rv1,
                g2=g2, be2=be2, rm2=rm2, rv2=rv2)


def fold_block_params(tp, eps=1e-5):
    """Fold eval-mode BatchNorm into the linear weights/biases (f32 fold, bf16 cast)."""
    L = tp["w1"].shape[0]
    scale1 = tp["g1"] / jnp.sqrt(tp["rv1"] + eps)
    shift1 = tp["be1"] - tp["rm1"] * scale1
    scale2 = tp["g2"] / jnp.sqrt(tp["rv2"] + eps)
    shift2 = tp["be2"] - tp["rm2"] * scale2
    return {
        "w1": (tp["w1"].T * scale1[None, :]).astype(jnp.bfloat16),
        "b1": (tp["b1"] * scale1 + shift1).reshape(1, L).astype(jnp.float32),
        "w2": (tp["w2"].T * scale2[None, :]).astype(jnp.bfloat16),
        "b2": (tp["b2"] * scale2 + shift2).reshape(1, L).astype(jnp.float32),
    }


def stack_folded(blocks):
    """Stack per-block folded params along a leading layer axis."""
    return {
        "w1": jnp.stack([b["w1"] for b in blocks]),  # (B, L, L) bf16
        "b1": jnp.stack([b["b1"] for b in blocks]),  # (B, 1, L) f32
        "w2": jnp.stack([b["w2"] for b in blocks]),  # (B, L, L) bf16
        "b2": jnp.stack([b["b2"] for b in blocks]),  # (B, 1, L) f32
    }


# ----------------------------- reference -------------------------------------


def reference_forward(x, tp, eps=1e-5):
    """Pure-JAX f32 reference of the original module (eval mode), unfolded BN."""
    scale1 = tp["g1"] / jnp.sqrt(tp["rv1"] + eps)
    shift1 = tp["be1"] - tp["rm1"] * scale1
    scale2 = tp["g2"] / jnp.sqrt(tp["rv2"] + eps)
    shift2 = tp["be2"] - tp["rm2"] * scale2
    z = x @ tp["w1"].T + tp["b1"]
    z = z * scale1 + shift1
    z = jnp.maximum(z, 0.0)
    z = z @ tp["w2"].T + tp["b2"]
    z = z * scale2 + shift2
    z = jnp.maximum(z, 0.0)
    return x + z


# ------------------------------- main -----------------------------------------


if __name__ == "__main__":
    L = 128  # l_size

    key = jax.random.PRNGKey(0)
    k_x1, k_p1, k_x2, k_p2 = jax.random.split(key, 4)

    # --- Test 1: single residual block (exactly the PyTorch module, eval mode)
    x1 = jax.random.normal(k_x1, (16, L), jnp.float32)
    tp1 = make_torch_style_params(k_p1, L)
    params1 = stack_folded([fold_block_params(tp1)])
    out1 = jax.block_until_ready(forward(x1, params1))
    ref1 = reference_forward(x1, tp1)
    assert out1.shape == x1.shape
    # bf16 matmul operands (f32 accumulation) -> relaxed tolerance vs f32 ref.
    assert jnp.allclose(out1, ref1, atol=5e-2, rtol=5e-2), "single-block mismatch"

    # --- Test 2: fused stack of 3 blocks, ragged batch (padding + 2 row tiles)
    x2 = jax.random.normal(k_x2, (40, L), jnp.float32)
    tps = [make_torch_style_params(k, L) for k in jax.random.split(k_p2, 3)]
    params2 = stack_folded([fold_block_params(tp) for tp in tps])
    out2 = jax.block_until_ready(forward(x2, params2))
    ref2 = x2
    for tp in tps:
        ref2 = reference_forward(ref2, tp)
    assert out2.shape == x2.shape
    assert jnp.allclose(out2, ref2, atol=7e-2, rtol=7e-2), "stacked mismatch"

    print("KERNEL_OK")
</pallas_src>

<mosaic_0001>
module attributes {stable_mosaic.version = 11 : i64} {
  func.func @fused_stack_kernel(%arg0: i32, %arg1: i32, %arg2: memref<16x128xf32, #tpu.memory_space<vmem>>, %arg3: memref<1x128x128xbf16, #tpu.memory_space<vmem>>, %arg4: memref<1x1x128xf32, #tpu.memory_space<vmem>>, %arg5: memref<1x128x128xbf16, #tpu.memory_space<vmem>>, %arg6: memref<1x1x128xf32, #tpu.memory_space<vmem>>, %arg7: memref<16x128xf32, #tpu.memory_space<vmem>>, %arg8: memref<16x128xf32, #tpu.memory_space<vmem>>) attributes {dimension_semantics = [#tpu.dimension_semantics<parallel>, #tpu.dimension_semantics<arbitrary>], iteration_bounds = array<i64: 1, 1>, scalar_prefetch = 0 : i64, scratch_operands = 1 : i64, tpu.core_type = #tpu.core_type<tc>, window_params = [{transform_indices = @transform_0, window_bounds = array<i64: 16, 128>}, {transform_indices = @transform_1, window_bounds = array<i64: 1, 128, 128>}, {transform_indices = @transform_2, window_bounds = array<i64: 1, 1, 128>}, {transform_indices = @transform_3, window_bounds = array<i64: 1, 128, 128>}, {transform_indices = @transform_4, window_bounds = array<i64: 1, 1, 128>}, {transform_indices = @transform_5, window_bounds = array<i64: 16, 128>}]} {
    %c0_i32 = arith.constant 0 : i32
    %0 = arith.cmpi eq, %arg1, %c0_i32 : i32
    %1 = arith.extui %0 : i1 to i32
    %c0_i32_0 = arith.constant 0 : i32
    %2 = arith.cmpi ne, %1, %c0_i32_0 : i32
    scf.if %2 {
      %c0_21 = arith.constant 0 : index
      %c0_22 = arith.constant 0 : index
      %29 = vector.load %arg2[%c0_21, %c0_22] : memref<16x128xf32, #tpu.memory_space<vmem>>, vector<16x128xf32>
      %c0_23 = arith.constant 0 : index
      %c0_24 = arith.constant 0 : index
      %30 = vector.load %arg8[%c0_23, %c0_24] : memref<16x128xf32, #tpu.memory_space<vmem>>, vector<16x128xf32>
      tpu.vector_store %arg8[%c0_23, %c0_24], %29 {strides = array<i32>} : memref<16x128xf32, #tpu.memory_space<vmem>>, vector<16x128xf32>,
    } else {
    }
    %c0 = arith.constant 0 : index
    %c0_1 = arith.constant 0 : index
    %3 = vector.load %arg8[%c0, %c0_1] : memref<16x128xf32, #tpu.memory_space<vmem>>, vector<16x128xf32>
    %4 = arith.truncf %3 : vector<16x128xf32> to vector<16x128xbf16>
    %c0_2 = arith.constant 0 : index
    %c0_3 = arith.constant 0 : index
    %c0_4 = arith.constant 0 : index
    %5 = vector.load %arg3[%c0_2, %c0_3, %c0_4] : memref<1x128x128xbf16, #tpu.memory_space<vmem>>, vector<1x128x128xbf16>
    %6 = vector.shape_cast %5 : vector<1x128x128xbf16> to vector<128x128xbf16>
    %cst = arith.constant dense<0.000000e+00> : vector<16x128xf32>
    %7 = tpu.matmul %4, %6, %cst {dimension_numbers = #tpu.dot_dimension_numbers<[1], [0], [0], [1], [0, 0, 1, 1], [], []>} : vector<16x128xbf16>, vector<128x128xbf16>, vector<16x128xf32> -> vector<16x128xf32>
    %c0_5 = arith.constant 0 : index
    %c0_6 = arith.constant 0 : index
    %c0_7 = arith.constant 0 : index
    %8 = vector.load %arg4[%c0_5, %c0_6, %c0_7] : memref<1x1x128xf32, #tpu.memory_space<vmem>>, vector<1x1x128xf32>
    %9 = vector.shape_cast %8 : vector<1x1x128xf32> to vector<1x128xf32>
    %10 = vector.broadcast %9 : vector<1x128xf32> to vector<16x128xf32>
    %11 = arith.addf %7, %10 : vector<16x128xf32>
    %cst_8 = arith.constant 0.000000e+00 : f32
    %12 = vector.broadcast %cst_8 : f32 to vector<16x128xf32>
    %13 = arith.maximumf %11, %12 : vector<16x128xf32>
    %14 = arith.truncf %13 : vector<16x128xf32> to vector<16x128xbf16>
    %c0_9 = arith.constant 0 : index
    %c0_10 = arith.constant 0 : index
    %c0_11 = arith.constant 0 : index
    %15 = vector.load %arg5[%c0_9, %c0_10, %c0_11] : memref<1x128x128xbf16, #tpu.memory_space<vmem>>, vector<1x128x128xbf16>
    %16 = vector.shape_cast %15 : vector<1x128x128xbf16> to vector<128x128xbf16>
    %cst_12 = arith.constant dense<0.000000e+00> : vector<16x128xf32>
    %17 = tpu.matmul %14, %16, %cst_12 {dimension_numbers = #tpu.dot_dimension_numbers<[1], [0], [0], [1], [0, 0, 1, 1], [], []>} : vector<16x128xbf16>, vector<128x128xbf16>, vector<16x128xf32> -> vector<16x128xf32>
    %c0_13 = arith.constant 0 : index
    %c0_14 = arith.constant 0 : index
    %c0_15 = arith.constant 0 : index
    %18 = vector.load %arg6[%c0_13, %c0_14, %c0_15] : memref<1x1x128xf32, #tpu.memory_space<vmem>>, vector<1x1x128xf32>
    %19 = vector.shape_cast %18 : vector<1x1x128xf32> to vector<1x128xf32>
    %20 = vector.broadcast %19 : vector<1x128xf32> to vector<16x128xf32>
    %21 = arith.addf %17, %20 : vector<16x128xf32>
    %cst_16 = arith.constant 0.000000e+00 : f32
    %22 = vector.broadcast %cst_16 : f32 to vector<16x128xf32>
    %23 = arith.maximumf %21, %22 : vector<16x128xf32>
    %24 = arith.addf %3, %23 : vector<16x128xf32>
    %c0_17 = arith.constant 0 : index
    %c0_18 = arith.constant 0 : index
    %25 = vector.load %arg8[%c0_17, %c0_18] : memref<16x128xf32, #tpu.memory_space<vmem>>, vector<16x128xf32>
    tpu.vector_store %arg8[%c0_17, %c0_18], %24 {strides = array<i32>} : memref<16x128xf32, #tpu.memory_space<vmem>>, vector<16x128xf32>,
    %c0_i32_19 = arith.constant 0 : i32
    %26 = arith.cmpi eq, %arg1, %c0_i32_19 : i32
    %27 = arith.extui %26 : i1 to i32
    %c0_i32_20 = arith.constant 0 : i32
    %28 = arith.cmpi ne, %27, %c0_i32_20 : i32
    scf.if %28 {
      %c0_21 = arith.constant 0 : index
      %c0_22 = arith.constant 0 : index
      %29 = vector.load %arg8[%c0_21, %c0_22] : memref<16x128xf32, #tpu.memory_space<vmem>>, vector<16x128xf32>
      %c0_23 = arith.constant 0 : index
      %c0_24 = arith.constant 0 : index
      %30 = vector.load %arg7[%c0_23, %c0_24] : memref<16x128xf32, #tpu.memory_space<vmem>>, vector<16x128xf32>
      tpu.vector_store %arg7[%c0_23, %c0_24], %29 {strides = array<i32>} : memref<16x128xf32, #tpu.memory_space<vmem>>, vector<16x128xf32>,
    } else {
    }
    return
  }
  func.func @transform_0(%arg0: i32, %arg1: i32) -> (i32, i32) {
    %c0_i32 = arith.constant 0 : i32
    %c0_i32_0 = arith.constant 0 : i32
    return %arg0, %c0_i32 : i32, i32
  }
  func.func @transform_1(%arg0: i32, %arg1: i32) -> (i32, i32, i32) {
    %c0_i32 = arith.constant 0 : i32
    %c0_i32_0 = arith.constant 0 : i32
    %c0_i32_1 = arith.constant 0 : i32
    return %arg1, %c0_i32, %c0_i32_0 : i32, i32, i32
  }
  func.func @transform_2(%arg0: i32, %arg1: i32) -> (i32, i32, i32) {
    %c0_i32 = arith.constant 0 : i32
    %c0_i32_0 = arith.constant 0 : i32
    %c0_i32_1 = arith.constant 0 : i32
    return %arg1, %c0_i32, %c0_i32_0 : i32, i32, i32
  }
  func.func @transform_3(%arg0: i32, %arg1: i32) -> (i32, i32, i32) {
    %c0_i32 = arith.constant 0 : i32
    %c0_i32_0 = arith.constant 0 : i32
    %c0_i32_1 = arith.constant 0 : i32
    return %arg1, %c0_i32, %c0_i32_0 : i32, i32, i32
  }
  func.func @transform_4(%arg0: i32, %arg1: i32) -> (i32, i32, i32) {
    %c0_i32 = arith.constant 0 : i32
    %c0_i32_0 = arith.constant 0 : i32
    %c0_i32_1 = arith.constant 0 : i32
    return %arg1, %c0_i32, %c0_i32_0 : i32, i32, i32
  }
  func.func @transform_5(%arg0: i32, %arg1: i32) -> (i32, i32) {
    %c0_i32 = arith.constant 0 : i32
    %c0_i32_0 = arith.constant 0 : i32
    return %arg0, %c0_i32 : i32, i32
  }
}

</mosaic_0001>

<bundles_post_ra>
// kernel: linear_stack_forward.1
= control target key start
LH: loop header
LB: loop body
LE: loop exit
PB: predicated region body
PF: predicated region fallthrough
CT: control target
= control target key end

     0   :  { %10 = vsyncpa [#allocation4], 0  ;;  %s584_s0 = inlined_call_operand.hbm [shape: f32[16,128], index: 0, kind: input, shape index: {}, may-alias: {0,5}]   ;;  %s585_s1 = inlined_call_operand.hbm [shape: bf16[1,128,128], index: 1, kind: input, shape index: {}]   ;;  %s586_s2 = inlined_call_operand.vmem [shape: f32[1,1,128], index: 2, kind: input, shape index: {}]   ;;  %s587_s3 = inlined_call_operand.hbm [shape: bf16[1,128,128], index: 3, kind: input, shape index: {}]   ;;  %s588_s4 = inlined_call_operand.vmem [shape: f32[1,1,128], index: 4, kind: input, shape index: {}]   ;;  %s589_s5 = inlined_call_operand.hbm [shape: f32[16,128], index: 5, kind: output, shape index: {}, may-alias: {0,5}]  }
   0x1   :  { %11 = vsyncpa [#allocation7], 0 }
   0x2   :  { %12 = vsyncpa [#allocation5], 0  ;;  %s520_s18 = smov [#allocation6]  }
   0x3   :  { %s30_s19 = sshll.u32 %s520_s18, 4  ;;  %s31_s19 = int_to_ptr.vmem [resolvable:$true] %s30_s19 }
   0x4   :  { %s442_s20 = scalar_lea.vmem %s31_s19, 1024  ;;  %p447_p1 = scmp.lt.s32.totalorder %s31_s19, %s31_s19 }
   0x5   :  { %p443_p0 = scmp.ne.s32.totalorder %s31_s19, %s442_s20  ;;  %p448_p2 = scmp.lt.s32.totalorder %s442_s20, %s442_s20 }
   0x7   :  { %p449_p3 = por %p448_p2, %p447_p1 }
   0x9   :  { %p450_p4 = pnand %p449_p3, %p443_p0 }
   0xb   :  { %453 = shalt.err (!%p450_p4)
}
   0xc   :  { %s521_s21 = smov 64   ;;  %s522_s22 = smov 4  }
   0xd   :  { %36 = dma.hbm_to_vmem [thread:$0]  %s585_s1, 1024, %s31_s19, [#allocation7], %s521_s21, %s521_s21, %s522_s22  }
   0xe   :  { %s523_s25 = smov [#allocation3]  }
   0xf   :  { %s18_s26 = sshll.u32 %s523_s25, 4  ;;  %s19_s26 = int_to_ptr.vmem [resolvable:$true] %s18_s26 }
  0x10   :  { %s462_s27 = scalar_lea.vmem %s19_s26, 256  ;;  %p467_p6 = scmp.lt.s32.totalorder %s19_s26, %s19_s26 }
  0x11   :  { %p463_p5 = scmp.ne.s32.totalorder %s19_s26, %s462_s27  ;;  %p468_p7 = scmp.lt.s32.totalorder %s462_s27, %s462_s27 }
  0x13   :  { %p469_p8 = por %p468_p7, %p467_p6 }
  0x15   :  { %p470_p9 = pnand %p469_p8, %p463_p5 }
  0x17   :  { %473 = shalt.err (!%p470_p9)
}
  0x18   :  { %s524_s28 = smov 128   ;;  %s525_s29 = smov 8  }
  0x19   :  { %24 = dma.hbm_to_vmem [thread:$0]  %s584_s0, 256, %s19_s26, [#allocation4], %s524_s28, %s524_s28, %s525_s29  }
  0x1a   :  { %s526_s1 = smov [#allocation8]  }
  0x1b   :  { %s44_s7 = sshll.u32 %s526_s1, 4  ;;  %s45_s7 = int_to_ptr.vmem [resolvable:$true] %s44_s7 }
  0x1c   :  { %s482_s8 = scalar_lea.vmem %s45_s7, 1024  ;;  %p487_p11 = scmp.lt.s32.totalorder %s45_s7, %s45_s7 }
  0x1d   :  { %p483_p10 = scmp.ne.s32.totalorder %s45_s7, %s482_s8  ;;  %p488_p12 = scmp.lt.s32.totalorder %s482_s8, %s482_s8 }
  0x1f   :  { %p489_p13 = por %p488_p12, %p487_p11 }
  0x21   :  { %p490_p0 = pnand %p489_p13, %p483_p10 }
  0x23   :  { %493 = shalt.err (!%p490_p0)
}
  0x24   :  { %50 = dma.hbm_to_vmem [thread:$0]  %s587_s3, 1024, %s45_s7, [#allocation7], %s521_s21, %s521_s21, %s522_s22  }
  0x25   :  { %514 = dma.done.wait [#allocation4], 256  }
  0x26   :  { %515 = vsyncadd [#allocation4], 4294967040 }
  0x27   :  { %516 = dma.done.wait [#allocation7], 2048  }
  0x28   :  { %517 = vsyncadd [#allocation7], 4294965248  ;;  %v527_v0 = vmov 0.0   ;;  %vm528_vm0 = vmmov 0   ;;  %v418_v1 = vld [vmem:[#allocation6 + $0x38] sm:$0xff]   ;;  %v419_v2 = vld [vmem:[#allocation6 + $0x30] sm:$0xff]  }
  0x29   :  { %368 = vmatprep.subr.bf16.mxu0 %v527_v0  ;;  %384 = vmatprep.mubr.msk.bf16.mxu0 %vm528_vm0, %v527_v0  ;;  %v420_v3 = vld [vmem:[#allocation6 + $0x28] sm:$0xff]   ;;  %v426_v4 = vld [vmem:[#allocation8 + $0x38] sm:$0xff]   ;;  %v421_v5 = vld [vmem:[#allocation6 + $0x20] sm:$0xff]  }
  0x2a   :  { %388 = vmatprep.subr.bf16.mxu1 %v527_v0  ;;  %404 = vmatprep.mubr.msk.bf16.mxu1 %vm528_vm0, %v527_v0  ;;  %v427_v6 = vld [vmem:[#allocation8 + $0x30] sm:$0xff]   ;;  %v422_v7 = vld [vmem:[#allocation6 + $0x18] sm:$0xff]   ;;  %v428_v8 = vld [vmem:[#allocation8 + $0x28] sm:$0xff]  }
  0x2b   :  { %369 = vmatpush3.bf16.msra.mxu0 %v418_v1  ;;  %389 = vmatpush3.bf16.msra.mxu1 %v426_v4  ;;  %v423_v9 = vld [vmem:[#allocation6 + $0x10] sm:$0xff]   ;;  %v429_v10 = vld [vmem:[#allocation8 + $0x20] sm:$0xff]   ;;  %v424_v11 = vld [vmem:[#allocation6 + $0x8] sm:$0xff]  }
  0x2c   :  { %370 = vmatprep.subr.bf16.mxu0 %v527_v0  ;;  %390 = vmatprep.subr.bf16.mxu1 %v527_v0  ;;  %v430_v12 = vld [vmem:[#allocation8 + $0x18] sm:$0xff]   ;;  %v425_v13 = vld [vmem:[#allocation6] sm:$0xff]   ;;  %v67_v14 = vld [vmem:[#allocation3] sm:$0xff] }
  0x2d   :  { %v68_v15 = vld [vmem:[#allocation3 + $0x8] sm:$0xff]  ;;  %v431_v17 = vld [vmem:[#allocation8 + $0x10] sm:$0xff]   ;;  %v432_v18 = vld [vmem:[#allocation8 + $0x8] sm:$0xff]  }
  0x2e   :  { %v73_v16 = vpack.c.bf16 %v68_v15, %v67_v14  ;;  %v433_v19 = vld [vmem:[#allocation8] sm:$0xff]   ;;  %v332_v20 = vld [vmem:[%s586_s2] ss:$0 sm:$0xff]  ;;  %s529_s2 = smov [#allocation9]  }
  0x2f   :  { %371 = vmatpush3.bf16.msra.mxu0 %v419_v2  ;;  %391 = vmatpush3.bf16.msra.mxu1 %v427_v6  ;;  %v341_v30 = vld [vmem:[%s588_s4] ss:$0 sm:$0xff]  ;;  %s319_s13 = sshll.u32 %s529_s2, 4  ;;  %s320_s13 = int_to_ptr.vmem [resolvable:$true] %s319_s13 }
  0x30   :  { %372 = vmatprep.subr.bf16.mxu0 %v527_v0  ;;  %392 = vmatprep.subr.bf16.mxu1 %v527_v0  ;;  %s494_s14 = scalar_lea.vmem %s320_s13, 256  ;;  %p499_p2 = scmp.lt.s32.totalorder %s320_s13, %s320_s13 }
  0x31   :  { %p495_p1 = scmp.ne.s32.totalorder %s320_s13, %s494_s14  ;;  %p500_p3 = scmp.lt.s32.totalorder %s494_s14, %s494_s14 }
  0x33   :  { %373 = vmatpush3.bf16.msra.mxu0 %v420_v3  ;;  %393 = vmatpush3.bf16.msra.mxu1 %v428_v8  ;;  %p501_p4 = por %p500_p3, %p499_p2 }
  0x34   :  { %374 = vmatprep.subr.bf16.mxu0 %v527_v0  ;;  %394 = vmatprep.subr.bf16.mxu1 %v527_v0 }
  0x35   :  { %p502_p5 = pnand %p501_p4, %p495_p1 }
  0x37   :  { %375 = vmatpush3.bf16.msra.mxu0 %v421_v5  ;;  %395 = vmatpush3.bf16.msra.mxu1 %v429_v10 }
  0x38   :  { %376 = vmatprep.subr.bf16.mxu0 %v527_v0  ;;  %396 = vmatprep.subr.bf16.mxu1 %v527_v0 }
  0x3b   :  { %377 = vmatpush3.bf16.msra.mxu0 %v422_v7  ;;  %397 = vmatpush3.bf16.msra.mxu1 %v430_v12 }
  0x3c   :  { %378 = vmatprep.subr.bf16.mxu0 %v527_v0  ;;  %398 = vmatprep.subr.bf16.mxu1 %v527_v0 }
  0x3f   :  { %379 = vmatpush3.bf16.msra.mxu0 %v423_v9  ;;  %399 = vmatpush3.bf16.msra.mxu1 %v431_v17 }
  0x40   :  { %380 = vmatprep.subr.bf16.mxu0 %v527_v0  ;;  %400 = vmatprep.subr.bf16.mxu1 %v527_v0 }
  0x43   :  { %381 = vmatpush3.bf16.msra.mxu0 %v424_v11  ;;  %401 = vmatpush3.bf16.msra.mxu1 %v432_v18 }
  0x44   :  { %382 = vmatprep.subr.bf16.mxu0 %v527_v0  ;;  %402 = vmatprep.subr.bf16.mxu1 %v527_v0 }
  0x47   :  { %383 = vmatpush3.bf16.msra.mxu0 %v425_v13  ;;  %403 = vmatpush3.bf16.msra.mxu1 %v433_v19 }
  0x4a   :  { %385 = vmatmul.mubr.bf16.vlgmr.msra.gmra.mxu0 %v73_v16 }
 0x10a   :  { %v179_v21 = vpop.f32.mrf.mxu0 }
 0x10b   :  { %v180_v23 = vadd.f32 %v332_v20, %v179_v21 }
 0x10c   :  { %v386_v22 = vpop.f32.mrf.mxu0 }
 0x10d   :  { %v186_v27 = vmax.f32 %v180_v23, 0.0 }
 0x10e   :  { %v182_v24 = vpop.f32.mrf.mxu0 }
 0x10f   :  { %v183_v25 = vadd.f32 %v332_v20, %v182_v24 }
 0x110   :  { %v387_v26 = vpop.f32.mrf.mxu0 }
 0x111   :  { %v187_v28 = vmax.f32 %v183_v25, 0.0 }
 0x113   :  { %v188_v29 = vpack.c.bf16 %v187_v28, %v186_v27 }
 0x115   :  { %405 = vmatmul.mubr.bf16.vlgmr.msra.gmra.mxu1 %v188_v29 }
 0x1d5   :  { %v294_v31 = vpop.f32.mrf.mxu1 }
 0x1d6   :  { %v295_v32 = vadd.f32 %v341_v30, %v294_v31 }
 0x1d7   :  { %v406_v33 = vpop.f32.mrf.mxu1 }
 0x1d8   :  { %v301_v34 = vmax.f32 %v295_v32, 0.0 }
 0x1d9   :  { %v297_v35 = vpop.f32.mrf.mxu1 }
 0x1da   :  { %v303_v36 = vadd.f32 %v301_v34, %v67_v14  ;;  %v298_v37 = vadd.f32 %v341_v30, %v297_v35 }
 0x1db   :  { %v407_v38 = vpop.f32.mrf.mxu1 }
 0x1dc   :  { %312 = vst [vmem:[#allocation9] sm:$0xff] %v303_v36  ;;  %v302_v39 = vmax.f32 %v298_v37, 0.0 }
 0x1de   :  { %v304_v40 = vadd.f32 %v302_v39, %v68_v15 }
 0x1e0   :  { %313 = vst [vmem:[#allocation9 + $0x8] sm:$0xff] %v304_v40 }
 0x1e1   :  { %505 = shalt.err (!%p502_p5)
}
 0x1e2   :  { %325 = dma.vmem_to_hbm [thread:$0]  %s320_s13, 256, %s589_s5, [#allocation5], %s524_s28, %s524_s28, %s525_s29  }
 0x1e3   :  { %518 = dma.done.wait [#allocation5], 256  }
 0x1e4   :  { %519 = vsyncadd [#allocation5], 4294967040 }
 0x1e5   :  { %329 = vsyncpa [#allocation4], 1 }
 0x1e6   :  { %330 = vsyncpa [#allocation7], 1 }
 0x1e7   :  { %331 = vsyncpa [#allocation5], 1 }

</bundles_post_ra>
